<compile_context>
chip_gen: v5e
topology: v5e:2x2
jax: 0.10.0
libtpu: 0.0.40
codegen_flags: <defaults>
</compile_context>

<pallas_src>
import functools

import jax
import jax.numpy as jnp
from jax.experimental import pallas as pl
from jax.experimental.pallas import tpu as pltpu


def _round_up(x, m):
    return (x + m - 1) // m * m


def _cdiv(a, b):
    return (a + b - 1) // b


def _linear_kernel(x_ref, w_ref, b_ref, o_ref):
    # x_ref: [tm, F_pad]    f32  (batch tile, full feature axis)
    # w_ref: [F_pad, N_pad] bf16 (resident in VMEM across all batch tiles)
    # b_ref: [1, N_pad]     f32  (resident)
    # o_ref: [tm, N_pad]    f32
    xb = x_ref[...].astype(jnp.bfloat16)                      # VPU cast, hidden under DMA
    o_ref[...] = jnp.dot(xb, w_ref[...],
                         preferred_element_type=jnp.float32) + b_ref[...]


def _choose_tm(B, F_pad, N_pad, x_bytes):
    """Batch tile: multiple of 16, VMEM-budgeted, >=2 tiles when B > 16."""
    budget = 12 << 20                                  # conservative vs 16 MiB (v5e scoped)
    resident = F_pad * N_pad * 2 + N_pad * 4           # weight (bf16) + bias (f32)
    per_row = 2 * (F_pad * x_bytes + N_pad * 4)        # double-buffered x tile + out tile
    tm_cap = (budget - resident) // per_row
    tm_cap = max(16, min(512, (tm_cap // 16) * 16))
    n_tiles = _cdiv(B, tm_cap)
    if B > 16:
        n_tiles = max(2, n_tiles)                      # keep both v7x TensorCores busy
    tm = min(tm_cap, max(16, _round_up(_cdiv(B, n_tiles), 16)))
    return tm


def linear_classifier(x_flat, w_pad, b_pad):
    """Padded linear head: returns [B_pad, N_pad] f32 = x @ w_pad + b_pad.

    x_flat: [B, F]          f32 (cast to bf16 inside the kernel)
    w_pad:  [F_pad, N_pad]  bf16, pre-transposed [features, classes], zero-padded
    b_pad:  [1, N_pad]      f32,  zero-padded
    Caller slices the result back to [B, num_classes].
    """
    B, F = x_flat.shape
    F_pad, N_pad = w_pad.shape
    x_bytes = x_flat.dtype.itemsize

    tm = _choose_tm(B, F_pad, N_pad, x_bytes)
    B_pad = _round_up(B, tm)

    x_p = x_flat
    if (B_pad != B) or (F_pad != F):
        # Zero-pad the remainder explicitly so padded rows/columns contribute 0.
        x_p = jnp.pad(x_p, ((0, B_pad - B), (0, F_pad - F)))

    grid = (B_pad // tm,)

    cost = pl.CostEstimate(
        flops=2 * B_pad * F_pad * N_pad,
        transcendentals=0,
        bytes_accessed=(B_pad * F_pad * x_bytes        # x read
                        + F_pad * N_pad * 2            # weight read (once)
                        + B_pad * N_pad * 4),          # output write
    )

    return pl.pallas_call(
        _linear_kernel,
        out_shape=jax.ShapeDtypeStruct((B_pad, N_pad), jnp.float32),
        grid_spec=pltpu.PrefetchScalarGridSpec(
            num_scalar_prefetch=0,
            grid=grid,
            in_specs=[
                pl.BlockSpec((tm, F_pad), lambda i: (i, 0)),       # x tile
                pl.BlockSpec((F_pad, N_pad), lambda i: (0, 0)),    # weight (resident)
                pl.BlockSpec((1, N_pad), lambda i: (0, 0)),        # bias (resident)
            ],
            out_specs=pl.BlockSpec((tm, N_pad), lambda i: (i, 0)),
        ),
        compiler_params=pltpu.CompilerParams(
            dimension_semantics=("parallel",),
        ),
        cost_estimate=cost,
    )(x_p, w_pad, b_pad)


@functools.partial(jax.jit, static_argnames=("num_classes",))
def _predict(x, w_pad, b_pad, num_classes):
    B = x.shape[0]
    x_flat = x.reshape(B, -1)                       # flatten "featurizer"
    out_padded = linear_classifier(x_flat, w_pad, b_pad)
    return out_padded[:B, :num_classes]


class AlgorithmPallas:
    """JAX/Pallas analogue of domainbed Algorithm with a concrete linear predict."""

    def __init__(self, num_classes, hparams, in_features, key):
        self.num_classes = num_classes
        self.hparams = hparams
        k_w, k_b = jax.random.split(key)
        # Deterministic, Kaiming-uniform-like init (matches nn.Linear scale),
        # stored in PyTorch nn.Linear layout [num_classes, in_features].
        bound = 1.0 / (in_features ** 0.5)
        self.weight = jax.random.uniform(
            k_w, (num_classes, in_features), jnp.float32, -bound, bound)
        self.bias = jax.random.uniform(
            k_b, (num_classes,), jnp.float32, -bound, bound)

        # One-time layout prep hoisted out of the forward path:
        #   transpose to [F, N] (K-major, classes as lanes), pad F -> 128
        #   multiple, classes -> 128 lanes, cast weight to bf16 (MXU-native).
        F = in_features
        F_pad = _round_up(F, 128)
        N_pad = _round_up(num_classes, 128)
        self._w_pad = jnp.pad(
            self.weight.T, ((0, F_pad - F), (0, N_pad - num_classes))
        ).astype(jnp.bfloat16)
        self._b_pad = jnp.pad(
            self.bias, (0, N_pad - num_classes)).reshape(1, N_pad).astype(jnp.float32)

    def predict(self, x):
        # x: NCHW [B, C, H, W] -> flatten featurizer -> linear classifier head
        return _predict(x, self._w_pad, self._b_pad, self.num_classes)

    def forward(self, x):
        return self.predict(x)

    __call__ = forward


if __name__ == "__main__":
    key = jax.random.PRNGKey(0)
    k_x, k_p = jax.random.split(key)

    # Small shapes: batch=2, channels=4, spatial=16x16, num_classes=7 (PACS-like)
    B, C, H, W = 2, 4, 16, 16
    num_classes = 7
    hparams = {"lr": 1e-3, "weight_decay": 0.0, "optimizer": "adam"}

    x = jax.random.normal(k_x, (B, C, H, W), jnp.float32)

    algo = AlgorithmPallas(num_classes, hparams, in_features=C * H * W, key=k_p)

    out = algo(x)
    out = jax.block_until_ready(out)

    # Reference check against plain JAX with the same bf16 weight/input
    # quantization and f32 accumulation.
    x_flat = x.reshape(B, -1)
    xb = x_flat.astype(jnp.bfloat16).astype(jnp.float32)
    wb = algo.weight.astype(jnp.bfloat16).astype(jnp.float32)
    ref = xb @ wb.T + algo.bias

    assert out.shape == (B, num_classes)
    assert out.dtype == jnp.float32
    assert jnp.allclose(out, ref, atol=2e-3, rtol=2e-3), float(
        jnp.max(jnp.abs(out - ref)))

    print("KERNEL_OK")
</pallas_src>

<mosaic_0001>
module attributes {stable_mosaic.version = 11 : i64} {
  func.func @_linear_kernel(%arg0: i32, %arg1: memref<16x1024xf32, #tpu.memory_space<vmem>>, %arg2: memref<1024x128xbf16, #tpu.memory_space<vmem>>, %arg3: memref<1x128xf32, #tpu.memory_space<vmem>>, %arg4: memref<16x128xf32, #tpu.memory_space<vmem>>) attributes {dimension_semantics = [#tpu.dimension_semantics<parallel>], iteration_bounds = array<i64: 1>, scalar_prefetch = 0 : i64, scratch_operands = 0 : i64, tpu.core_type = #tpu.core_type<tc>, window_params = [{transform_indices = @transform_0, window_bounds = array<i64: 16, 1024>}, {pipeline_mode = #tpu.pipeline_mode<synchronous>, transform_indices = @transform_1, window_bounds = array<i64: 1024, 128>}, {pipeline_mode = #tpu.pipeline_mode<synchronous>, transform_indices = @transform_2, window_bounds = array<i64: 1, 128>}, {transform_indices = @transform_3, window_bounds = array<i64: 16, 128>}]} {
    %c0 = arith.constant 0 : index
    %c0_0 = arith.constant 0 : index
    %0 = vector.load %arg1[%c0, %c0_0] : memref<16x1024xf32, #tpu.memory_space<vmem>>, vector<16x1024xf32>
    %1 = arith.truncf %0 : vector<16x1024xf32> to vector<16x1024xbf16>
    %c0_1 = arith.constant 0 : index
    %c0_2 = arith.constant 0 : index
    %2 = vector.load %arg2[%c0_1, %c0_2] : memref<1024x128xbf16, #tpu.memory_space<vmem>>, vector<1024x128xbf16>
    %cst = arith.constant dense<0.000000e+00> : vector<16x128xf32>
    %3 = tpu.matmul %1, %2, %cst {dimension_numbers = #tpu.dot_dimension_numbers<[1], [0], [0], [1], [0, 0, 1, 1], [], []>} : vector<16x1024xbf16>, vector<1024x128xbf16>, vector<16x128xf32> -> vector<16x128xf32>
    %c0_3 = arith.constant 0 : index
    %c0_4 = arith.constant 0 : index
    %4 = vector.load %arg3[%c0_3, %c0_4] : memref<1x128xf32, #tpu.memory_space<vmem>>, vector<1x128xf32>
    %5 = vector.broadcast %4 : vector<1x128xf32> to vector<16x128xf32>
    %6 = arith.addf %3, %5 : vector<16x128xf32>
    %c0_5 = arith.constant 0 : index
    %c0_6 = arith.constant 0 : index
    %7 = vector.load %arg4[%c0_5, %c0_6] : memref<16x128xf32, #tpu.memory_space<vmem>>, vector<16x128xf32>
    tpu.vector_store %arg4[%c0_5, %c0_6], %6 {strides = array<i32>} : memref<16x128xf32, #tpu.memory_space<vmem>>, vector<16x128xf32>,
    return
  }
  func.func @transform_0(%arg0: i32) -> (i32, i32) {
    %c0_i32 = arith.constant 0 : i32
    %c0_i32_0 = arith.constant 0 : i32
    return %arg0, %c0_i32 : i32, i32
  }
  func.func @transform_1(%arg0: i32) -> (i32, i32) {
    %c0_i32 = arith.constant 0 : i32
    %c0_i32_0 = arith.constant 0 : i32
    %c0_i32_1 = arith.constant 0 : i32
    return %c0_i32, %c0_i32_0 : i32, i32
  }
  func.func @transform_2(%arg0: i32) -> (i32, i32) {
    %c0_i32 = arith.constant 0 : i32
    %c0_i32_0 = arith.constant 0 : i32
    %c0_i32_1 = arith.constant 0 : i32
    return %c0_i32, %c0_i32_0 : i32, i32
  }
  func.func @transform_3(%arg0: i32) -> (i32, i32) {
    %c0_i32 = arith.constant 0 : i32
    %c0_i32_0 = arith.constant 0 : i32
    return %arg0, %c0_i32 : i32, i32
  }
}

</mosaic_0001>

<bundles_post_ra>
// kernel: _predict.1
= control target key start
LH: loop header
LB: loop body
LE: loop exit
PB: predicated region body
PF: predicated region fallthrough
CT: control target
= control target key end

     0   :  { %8 = vsyncpa [#allocation3], 0  ;;  %s1039_s15 = smov [#allocation2]   ;;  %s1040_s17 = smov 64   ;;  %s1122_s0 = inlined_call_operand.vmem [shape: f32[16,1024], index: 0, kind: input, shape index: {}]   ;;  %s1123_s1 = inlined_call_operand.hbm [shape: bf16[1024,128], index: 1, kind: input, shape index: {}]   ;;  %s1124_s2 = inlined_call_operand.vmem [shape: f32[1,128], index: 2, kind: input, shape index: {}]   ;;  %s1125_s3 = inlined_call_operand.vmem [shape: f32[16,128], index: 3, kind: output, shape index: {}]  }
   0x1   :  { %s15_s14 = sshll.u32 %s1123_s1, 4  ;;  %s17_s16 = sshll.u32 %s1039_s15, 4  ;;  %s16_s14 = int_to_ptr.hbm [resolvable:$true] %s15_s14  ;;  %s18_s16 = int_to_ptr.vmem [resolvable:$true] %s17_s16 }
   0x2   :  { %s1041_s18 = smov 4  }
   0x3   :  { %23 = dma.hbm_to_vmem [thread:$0]  %s16_s14, 8192, %s18_s16, [#allocation3], %s1040_s17, %s1040_s17, %s1041_s18  }
   0x4   :  { %1037 = dma.done.wait [#allocation3], 8192  }
   0x5   :  { %1038 = vsyncadd [#allocation3], 4294959104  ;;  %v952_v0 = vld [vmem:[#allocation2 + $0x38] sm:$0xff]  ;;  %v951_v4 = vld [vmem:[#allocation2 + $0x30] sm:$0xff] }
   0x6   :  { %v960_v1 = vld [vmem:[#allocation2 + $0x78] sm:$0xff]  ;;  %570 = vmatpush.bf16.msra.mxu0 %v952_v0  ;;  %v959_v5 = vld [vmem:[#allocation2 + $0x70] sm:$0xff]  ;;  %v950_v8 = vld [vmem:[#allocation2 + $0x28] sm:$0xff] }
   0x7   :  { %v968_v2 = vld [vmem:[#allocation2 + $0xb8] sm:$0xff]  ;;  %584 = vmatpush.bf16.msra.mxu1 %v960_v1  ;;  %v967_v6 = vld [vmem:[#allocation2 + $0xb0] sm:$0xff]  ;;  %v958_v9 = vld [vmem:[#allocation2 + $0x68] sm:$0xff] }
   0x8   :  { %v976_v3 = vld [vmem:[#allocation2 + $0xf8] sm:$0xff]  ;;  %598 = vmatpush.bf16.msra.mxu2 %v968_v2  ;;  %v975_v7 = vld [vmem:[#allocation2 + $0xf0] sm:$0xff]  ;;  %v966_v10 = vld [vmem:[#allocation2 + $0xa8] sm:$0xff] }
   0x9   :  { %612 = vmatpush.bf16.msra.mxu3 %v976_v3  ;;  %v974_v11 = vld [vmem:[#allocation2 + $0xe8] sm:$0xff]  ;;  %v949_v12 = vld [vmem:[#allocation2 + $0x20] sm:$0xff]  ;;  %v948_v16 = vld [vmem:[#allocation2 + $0x18] sm:$0xff] }
   0xa   :  { %571 = vmatpush.bf16.msra.mxu0 %v951_v4  ;;  %v957_v13 = vld [vmem:[#allocation2 + $0x60] sm:$0xff]  ;;  %v956_v17 = vld [vmem:[#allocation2 + $0x58] sm:$0xff]  ;;  %v947_v20 = vld [vmem:[#allocation2 + $0x10] sm:$0xff] }
   0xb   :  { %585 = vmatpush.bf16.msra.mxu1 %v959_v5  ;;  %v965_v14 = vld [vmem:[#allocation2 + $0xa0] sm:$0xff]  ;;  %v964_v18 = vld [vmem:[#allocation2 + $0x98] sm:$0xff]  ;;  %v955_v21 = vld [vmem:[#allocation2 + $0x50] sm:$0xff] }
   0xc   :  { %599 = vmatpush.bf16.msra.mxu2 %v967_v6  ;;  %v973_v15 = vld [vmem:[#allocation2 + $0xe0] sm:$0xff]  ;;  %v972_v19 = vld [vmem:[#allocation2 + $0xd8] sm:$0xff]  ;;  %v963_v22 = vld [vmem:[#allocation2 + $0x90] sm:$0xff] }
   0xd   :  { %613 = vmatpush.bf16.msra.mxu3 %v975_v7  ;;  %v971_v23 = vld [vmem:[#allocation2 + $0xd0] sm:$0xff]  ;;  %v946_v24 = vld [vmem:[#allocation2 + $0x8] sm:$0xff]  ;;  %v945_v28 = vld [vmem:[#allocation2] sm:$0xff] }
   0xe   :  { %572 = vmatpush.bf16.msra.mxu0 %v950_v8  ;;  %v954_v25 = vld [vmem:[#allocation2 + $0x48] sm:$0xff]  ;;  %v953_v29 = vld [vmem:[#allocation2 + $0x40] sm:$0xff]  ;;  %v984_v32 = vld [vmem:[#allocation2 + $0x138] sm:$0xff] }
   0xf   :  { %586 = vmatpush.bf16.msra.mxu1 %v958_v9  ;;  %v962_v26 = vld [vmem:[#allocation2 + $0x88] sm:$0xff]  ;;  %v961_v30 = vld [vmem:[#allocation2 + $0x80] sm:$0xff]  ;;  %v992_v33 = vld [vmem:[#allocation2 + $0x178] sm:$0xff] }
  0x10   :  { %600 = vmatpush.bf16.msra.mxu2 %v966_v10  ;;  %v970_v27 = vld [vmem:[#allocation2 + $0xc8] sm:$0xff]  ;;  %v969_v31 = vld [vmem:[#allocation2 + $0xc0] sm:$0xff]  ;;  %v32_v34 = vld [vmem:[%s1122_s0 + $0x10] sm:$0xff] }
  0x11   :  { %614 = vmatpush.bf16.msra.mxu3 %v974_v11  ;;  %v40_v35 = vld [vmem:[%s1122_s0 + $0x50] sm:$0xff]  ;;  %v30_v36 = vld [vmem:[%s1122_s0] sm:$0xff]  ;;  %v33_v38 = vld [vmem:[%s1122_s0 + $0x18] sm:$0xff] }
  0x12   :  { %573 = vmatpush.bf16.msra.mxu0 %v949_v12  ;;  %v38_v37 = vld [vmem:[%s1122_s0 + $0x40] sm:$0xff]  ;;  %v41_v39 = vld [vmem:[%s1122_s0 + $0x58] sm:$0xff]  ;;  %v31_v40 = vld [vmem:[%s1122_s0 + $0x8] sm:$0xff]  ;;  %v48_v44 = vpack.c.bf16 %v40_v35, %v32_v34 }
  0x13   :  { %587 = vmatpush.bf16.msra.mxu1 %v957_v13  ;;  %v39_v41 = vld [vmem:[%s1122_s0 + $0x48] sm:$0xff]  ;;  %v1000_v42 = vld [vmem:[#allocation2 + $0x1b8] sm:$0xff]  ;;  %v46_v45 = vpack.c.bf16 %v38_v37, %v30_v36  ;;  %v49_v46 = vpack.c.bf16 %v41_v39, %v33_v38  ;;  %v983_v48 = vld [vmem:[#allocation2 + $0x130] sm:$0xff] }
  0x14   :  { %601 = vmatpush.bf16.msra.mxu2 %v965_v14  ;;  %v1008_v43 = vld [vmem:[#allocation2 + $0x1f8] sm:$0xff]  ;;  %v47_v47 = vpack.c.bf16 %v39_v41, %v31_v40  ;;  %v991_v49 = vld [vmem:[#allocation2 + $0x170] sm:$0xff]  ;;  %v982_v52 = vld [vmem:[#allocation2 + $0x128] sm:$0xff] }
  0x15   :  { %615 = vmatpush.bf16.msra.mxu3 %v973_v15  ;;  %v999_v50 = vld [vmem:[#allocation2 + $0x1b0] sm:$0xff]  ;;  %v990_v53 = vld [vmem:[#allocation2 + $0x168] sm:$0xff]  ;;  %v981_v56 = vld [vmem:[#allocation2 + $0x120] sm:$0xff] }
  0x16   :  { %574 = vmatpush.bf16.msra.mxu0 %v948_v16  ;;  %v1007_v51 = vld [vmem:[#allocation2 + $0x1f0] sm:$0xff]  ;;  %v998_v54 = vld [vmem:[#allocation2 + $0x1a8] sm:$0xff]  ;;  %v989_v57 = vld [vmem:[#allocation2 + $0x160] sm:$0xff] }
  0x17   :  { %588 = vmatpush.bf16.msra.mxu1 %v956_v17  ;;  %v1006_v55 = vld [vmem:[#allocation2 + $0x1e8] sm:$0xff]  ;;  %v997_v58 = vld [vmem:[#allocation2 + $0x1a0] sm:$0xff]  ;;  %v980_v60 = vld [vmem:[#allocation2 + $0x118] sm:$0xff] }
  0x18   :  { %602 = vmatpush.bf16.msra.mxu2 %v964_v18  ;;  %v1005_v59 = vld [vmem:[#allocation2 + $0x1e0] sm:$0xff]  ;;  %v988_v61 = vld [vmem:[#allocation2 + $0x158] sm:$0xff]  ;;  %v979_v0 = vld [vmem:[#allocation2 + $0x110] sm:$0xff] }
  0x19   :  { %616 = vmatpush.bf16.msra.mxu3 %v972_v19  ;;  %v996_v62 = vld [vmem:[#allocation2 + $0x198] sm:$0xff]  ;;  %v987_v1 = vld [vmem:[#allocation2 + $0x150] sm:$0xff]  ;;  %v978_v4 = vld [vmem:[#allocation2 + $0x108] sm:$0xff] }
  0x1a   :  { %575 = vmatpush.bf16.msra.mxu0 %v947_v20  ;;  %v1004_v63 = vld [vmem:[#allocation2 + $0x1d8] sm:$0xff]  ;;  %v995_v2 = vld [vmem:[#allocation2 + $0x190] sm:$0xff]  ;;  %v986_v5 = vld [vmem:[#allocation2 + $0x148] sm:$0xff] }
  0x1b   :  { %589 = vmatpush.bf16.msra.mxu1 %v955_v21  ;;  %v1003_v3 = vld [vmem:[#allocation2 + $0x1d0] sm:$0xff]  ;;  %v994_v6 = vld [vmem:[#allocation2 + $0x188] sm:$0xff]  ;;  %v977_v8 = vld [vmem:[#allocation2 + $0x100] sm:$0xff] }
  0x1c   :  { %603 = vmatpush.bf16.msra.mxu2 %v963_v22  ;;  %v1002_v7 = vld [vmem:[#allocation2 + $0x1c8] sm:$0xff]  ;;  %v985_v9 = vld [vmem:[#allocation2 + $0x140] sm:$0xff]  ;;  %v36_v16 = vld [vmem:[%s1122_s0 + $0x30] sm:$0xff] }
  0x1d   :  { %617 = vmatpush.bf16.msra.mxu3 %v971_v23  ;;  %v993_v10 = vld [vmem:[#allocation2 + $0x180] sm:$0xff]  ;;  %v35_v14 = vld [vmem:[%s1122_s0 + $0x28] sm:$0xff]  ;;  %v44_v17 = vld [vmem:[%s1122_s0 + $0x70] sm:$0xff] }
  0x1e   :  { %576 = vmatpush.bf16.msra.mxu0 %v946_v24  ;;  %v1001_v11 = vld [vmem:[#allocation2 + $0x1c0] sm:$0xff]  ;;  %v43_v15 = vld [vmem:[%s1122_s0 + $0x68] sm:$0xff]  ;;  %v37_v18 = vld [vmem:[%s1122_s0 + $0x38] sm:$0xff]  ;;  %v52_v22 = vpack.c.bf16 %v44_v17, %v36_v16 }
  0x1f   :  { %590 = vmatpush.bf16.msra.mxu1 %v954_v25  ;;  %v34_v12 = vld [vmem:[%s1122_s0 + $0x20] sm:$0xff]  ;;  %v45_v19 = vld [vmem:[%s1122_s0 + $0x78] sm:$0xff]  ;;  %v51_v21 = vpack.c.bf16 %v43_v15, %v35_v14 }
  0x20   :  { %604 = vmatpush.bf16.msra.mxu2 %v962_v26  ;;  %v42_v13 = vld [vmem:[%s1122_s0 + $0x60] sm:$0xff]  ;;  %v53_v23 = vpack.c.bf16 %v45_v19, %v37_v18 }
  0x21   :  { %618 = vmatpush.bf16.msra.mxu3 %v970_v27  ;;  %v50_v20 = vpack.c.bf16 %v42_v13, %v34_v12  ;;  %v1012_v25 = vld [vmem:[%s1124_s2] ss:$0 sm:$0xff] }
  0x22   :  { %577 = vmatpush.bf16.msra.mxu0 %v945_v28 }
  0x23   :  { %591 = vmatpush.bf16.msra.mxu1 %v953_v29 }
  0x24   :  { %605 = vmatpush.bf16.msra.mxu2 %v961_v30 }
  0x25   :  { %619 = vmatpush.bf16.msra.mxu3 %v969_v31  ;;  %578 = vmatmul.bf16.vlgmr.msra.gmra.mxu0 %v46_v45 }
  0x26   :  { %626 = vmatpush.bf16.msrb.mxu0 %v984_v32  ;;  %592 = vmatmul.bf16.vlgmr.msra.gmra.mxu1 %v47_v47 }
  0x27   :  { %640 = vmatpush.bf16.msrb.mxu1 %v992_v33  ;;  %606 = vmatmul.bf16.vlgmr.msra.gmra.mxu2 %v48_v44 }
  0x28   :  { %654 = vmatpush.bf16.msrb.mxu2 %v1000_v42  ;;  %620 = vmatmul.bf16.vlgmr.msra.gmra.mxu3 %v49_v46 }
  0x29   :  { %668 = vmatpush.bf16.msrb.mxu3 %v1008_v43 }
  0x2a   :  { %627 = vmatpush.bf16.msrb.mxu0 %v983_v48 }
  0x2b   :  { %641 = vmatpush.bf16.msrb.mxu1 %v991_v49 }
  0x2c   :  { %655 = vmatpush.bf16.msrb.mxu2 %v999_v50 }
  0x2d   :  { %669 = vmatpush.bf16.msrb.mxu3 %v1007_v51 }
  0x2e   :  { %628 = vmatpush.bf16.msrb.mxu0 %v982_v52 }
  0x2f   :  { %642 = vmatpush.bf16.msrb.mxu1 %v990_v53 }
  0x30   :  { %656 = vmatpush.bf16.msrb.mxu2 %v998_v54 }
  0x31   :  { %670 = vmatpush.bf16.msrb.mxu3 %v1006_v55 }
  0x32   :  { %629 = vmatpush.bf16.msrb.mxu0 %v981_v56 }
  0x33   :  { %643 = vmatpush.bf16.msrb.mxu1 %v989_v57 }
  0x34   :  { %657 = vmatpush.bf16.msrb.mxu2 %v997_v58 }
  0x35   :  { %671 = vmatpush.bf16.msrb.mxu3 %v1005_v59 }
  0x36   :  { %630 = vmatpush.bf16.msrb.mxu0 %v980_v60 }
  0x37   :  { %644 = vmatpush.bf16.msrb.mxu1 %v988_v61 }
  0x38   :  { %658 = vmatpush.bf16.msrb.mxu2 %v996_v62 }
  0x39   :  { %672 = vmatpush.bf16.msrb.mxu3 %v1004_v63 }
  0x3a   :  { %631 = vmatpush.bf16.msrb.mxu0 %v979_v0 }
  0x3b   :  { %645 = vmatpush.bf16.msrb.mxu1 %v987_v1 }
  0x3c   :  { %659 = vmatpush.bf16.msrb.mxu2 %v995_v2 }
  0x3d   :  { %673 = vmatpush.bf16.msrb.mxu3 %v1003_v3 }
  0x3e   :  { %632 = vmatpush.bf16.msrb.mxu0 %v978_v4 }
  0x3f   :  { %646 = vmatpush.bf16.msrb.mxu1 %v986_v5 }
  0x40   :  { %660 = vmatpush.bf16.msrb.mxu2 %v994_v6 }
  0x41   :  { %674 = vmatpush.bf16.msrb.mxu3 %v1002_v7 }
  0x42   :  { %633 = vmatpush.bf16.msrb.mxu0 %v977_v8 }
  0x43   :  { %647 = vmatpush.bf16.msrb.mxu1 %v985_v9 }
  0x44   :  { %661 = vmatpush.bf16.msrb.mxu2 %v993_v10 }
  0x45   :  { %675 = vmatpush.bf16.msrb.mxu3 %v1001_v11  ;;  %634 = vmatmul.bf16.vlgmr.msrb.gmra.mxu0 %v50_v20 }
  0x46   :  { %648 = vmatmul.bf16.vlgmr.msrb.gmra.mxu1 %v51_v21 }
  0x47   :  { %662 = vmatmul.bf16.vlgmr.msrb.gmra.mxu2 %v52_v22 }
  0x48   :  { %676 = vmatmul.bf16.vlgmr.msrb.gmra.mxu3 %v53_v23 }
  0xa2   :  { %v579_v24 = vpop.f32.mrf.mxu0 }
  0xa3   :  { %v593_v26 = vpop.f32.mrf.mxu1  ;;  %v580_v27 = vadd.f32 %v1012_v25, %v579_v24 }
  0xa5   :  { %v594_v30 = vadd.f32 %v593_v26, %v580_v27 }
  0xaa   :  { %v607_v28 = vpop.f32.mrf.mxu2  ;;  %v581_v31 = vpop.f32.mrf.mxu0 }
  0xab   :  { %v621_v29 = vpop.f32.mrf.mxu3  ;;  %v595_v32 = vpop.f32.mrf.mxu1  ;;  %v608_v33 = vadd.f32 %v607_v28, %v594_v30  ;;  %v582_v34 = vadd.f32 %v1012_v25, %v581_v31 }
  0xad   :  { %v622_v37 = vadd.f32 %v621_v29, %v608_v33  ;;  %v596_v38 = vadd.f32 %v595_v32, %v582_v34 }
  0xb2   :  { %v609_v35 = vpop.f32.mrf.mxu2 }
  0xb3   :  { %v623_v36 = vpop.f32.mrf.mxu3  ;;  %v610_v42 = vadd.f32 %v609_v35, %v596_v38 }
  0xb5   :  { %v624_v46 = vadd.f32 %v623_v36, %v610_v42 }
  0xc2   :  { %v635_v39 = vpop.f32.mrf.mxu0 }
  0xc3   :  { %v636_v40 = vadd.f32 %v635_v39, %v622_v37  ;;  %v649_v41 = vpop.f32.mrf.mxu1 }
  0xc5   :  { %v650_v43 = vadd.f32 %v649_v41, %v636_v40 }
  0xca   :  { %v663_v44 = vpop.f32.mrf.mxu2  ;;  %v637_v48 = vpop.f32.mrf.mxu0 }
  0xcb   :  { %v677_v45 = vpop.f32.mrf.mxu3  ;;  %v664_v47 = vadd.f32 %v663_v44, %v650_v43  ;;  %v638_v50 = vadd.f32 %v637_v48, %v624_v46  ;;  %v651_v51 = vpop.f32.mrf.mxu1 }
  0xcd   :  { %v678_v49 = vadd.f32 %v677_v45, %v664_v47  ;;  %v652_v52 = vadd.f32 %v651_v51, %v638_v50 }
  0xcf   :  { %682 = vst [vmem:[%s1125_s3] sm:$0xff] %v678_v49 }
  0xd2   :  { %v665_v53 = vpop.f32.mrf.mxu2 }
  0xd3   :  { %v666_v54 = vadd.f32 %v665_v53, %v652_v52  ;;  %v679_v55 = vpop.f32.mrf.mxu3 }
  0xd5   :  { %v680_v56 = vadd.f32 %v679_v55, %v666_v54 }
  0xd7   :  { %683 = vst [vmem:[%s1125_s3 + $0x8] sm:$0xff] %v680_v56 }
  0xd8   :  { %688 = vsyncpa [#allocation3], 1 }

</bundles_post_ra>
